<compile_context>
chip_gen: v7x
topology: tpu7x:2x2x1
jax: 0.10.0
libtpu: 0.0.40
codegen_flags: <defaults>
</compile_context>

<pallas_src>
import functools

import jax
import jax.numpy as jnp
from jax.experimental import pallas as pl
from jax.experimental.pallas import tpu as pltpu


def _round_up(n: int, m: int) -> int:
    return ((n + m - 1) // m) * m


def _round_down(n: int, m: int) -> int:
    return (n // m) * m


@functools.lru_cache(maxsize=1)
def _vmem_capacity_bytes() -> int:
    """Per-core VMEM capacity; conservative 64 MiB (v7x per-TC) fallback."""
    default = 64 * 1024 * 1024
    try:
        info = pltpu.get_tpu_info()
        cap = int(getattr(info, "vmem_capacity_bytes", default))
        return cap if cap > 0 else default
    except Exception:  # older jax / query failure -> be conservative
        return default


def _choose_tm(m: int, row_bytes: int, fixed_bytes: int, vmem_cap: int,
               sublane: int) -> int:
    """Pick the largest row tile that fits ~75% of VMEM, keeps >=2 grid steps
    once m > 256 (so v7x's second TensorCore is not idle), and is 128/sublane
    aligned (or equal to the full row count, which is always layout-legal)."""
    budget = int(0.75 * vmem_cap) - fixed_bytes
    cap = budget // row_bytes if (budget > 0 and row_bytes > 0) else sublane
    cap = int(max(sublane, min(cap, 1024)))

    if m <= 256:
        # Single tile unless the rows are so wide that VMEM forces a split.
        return m if m <= cap else max(sublane, _round_down(cap, sublane))

    # m > 256: big 128-aligned tiles, >= 2 grid steps for megacore sharding.
    cap = min(cap, m // 2)
    cap128 = _round_down(cap, 128)
    if cap128 >= 128:
        for tm in range(cap128, 0, -128):
            if m % tm == 0:          # prefer a divisor -> no ragged tail block
                return tm
        return cap128                # ragged tail handled by Pallas masking
    return max(sublane, _round_down(cap, sublane))


def _adapter_kernel(x_ref, wdt_ref, wut_ref, o_ref):
    # x_ref:   (tm, D)  tile of flattened input rows, native dtype
    # wdt_ref: (D, H)   down-projection, pre-transposed to (K, N) layout
    # wut_ref: (H, D)   up-projection,   pre-transposed to (K, N) layout
    # o_ref:   (tm, D)
    cdt = wdt_ref.dtype
    x = x_ref[...].astype(cdt)                      # per-tile cast (in VMEM)
    h = jnp.dot(x, wdt_ref[...], preferred_element_type=jnp.float32)
    h = jnp.maximum(h, 0.0).astype(cdt)             # ReLU on the f32 acc
    out = jnp.dot(h, wut_ref[...], preferred_element_type=jnp.float32)
    o_ref[...] = out.astype(o_ref.dtype)


def prepare_adapter_weights(w_down, w_up, compute_dtype=jnp.bfloat16):
    """One-time weight prep (hoist out of the per-call path).

    Args:
      w_down: (hidden_dim, in_dim)  -- PyTorch nn.Linear weight layout
      w_up:   (in_dim, hidden_dim)  -- PyTorch nn.Linear weight layout
    Returns:
      wd_t: (in_dim, hidden_dim), wu_t: (hidden_dim, in_dim) in compute_dtype,
      i.e. MXU-native (K, N) operands for the two in-kernel matmuls.
    """
    wd_t = jnp.asarray(w_down).astype(compute_dtype).T
    wu_t = jnp.asarray(w_up).astype(compute_dtype).T
    return wd_t, wu_t


@functools.partial(jax.jit, static_argnames=("out_dtype",))
def adapter_forward_prepared(x, wd_t, wu_t, *, out_dtype=None):
    """Fused adapter forward using prepared (transposed/cast) weights.

    Args:
      x:    (..., in_dim), any float dtype (cast per-tile in the kernel).
      wd_t: (in_dim, hidden_dim)  from prepare_adapter_weights.
      wu_t: (hidden_dim, in_dim)  from prepare_adapter_weights.
      out_dtype: output dtype; None -> x.dtype (module semantics).  Pass
        jnp.bfloat16 to halve HBM writeback when the consumer accepts it.
    Returns:
      (..., in_dim) array of out_dtype.
    """
    orig_shape = x.shape
    in_dim = x.shape[-1]
    hidden = wd_t.shape[1]
    assert wd_t.shape == (in_dim, hidden), (wd_t.shape, in_dim, hidden)
    assert wu_t.shape == (hidden, in_dim), (wu_t.shape, in_dim, hidden)
    out_dtype = x.dtype if out_dtype is None else jnp.dtype(out_dtype)

    x2d = x.reshape(-1, in_dim)          # flatten leading dims (no copy)
    M = x2d.shape[0]

    x_bytes = jnp.dtype(x.dtype).itemsize
    c_bytes = jnp.dtype(wd_t.dtype).itemsize
    o_bytes = jnp.dtype(out_dtype).itemsize
    sublane = {4: 8, 2: 16, 1: 32}.get(c_bytes, 8)

    vmem_cap = _vmem_capacity_bytes()
    # Two grid-invariant weight slabs, double-buffered by the pipeliner.
    fixed_bytes = 2 * 2 * in_dim * hidden * c_bytes
    # Per-row VMEM: double-buffered x/out tiles + in-kernel temporaries
    # (cast x, f32 second-matmul accumulator, f32 h accumulator + cast h).
    row_bytes = (2 * in_dim * x_bytes
                 + 2 * in_dim * o_bytes
                 + in_dim * (c_bytes + 4)
                 + hidden * (c_bytes + 4))

    tm = _choose_tm(M, row_bytes, fixed_bytes, vmem_cap, sublane)
    need = fixed_bytes + tm * row_bytes
    vmem_limit = int(min(0.9 * vmem_cap, max(32 * 1024 * 1024,
                                             need + 8 * 1024 * 1024)))

    out2d = pl.pallas_call(
        _adapter_kernel,
        out_shape=jax.ShapeDtypeStruct((M, in_dim), out_dtype),
        grid_spec=pltpu.PrefetchScalarGridSpec(
            num_scalar_prefetch=0,
            grid=(pl.cdiv(M, tm),),
            in_specs=[
                pl.BlockSpec((tm, in_dim), lambda i: (i, 0)),
                # Weight slabs are grid-invariant full blocks (DMA'd once).
                pl.BlockSpec((in_dim, hidden), lambda i: (0, 0)),
                pl.BlockSpec((hidden, in_dim), lambda i: (0, 0)),
            ],
            out_specs=pl.BlockSpec((tm, in_dim), lambda i: (i, 0)),
        ),
        compiler_params=pltpu.CompilerParams(
            dimension_semantics=("parallel",),
            vmem_limit_bytes=vmem_limit),
    )(x2d, wd_t, wu_t)

    return out2d.reshape(orig_shape)


def continual_adapter_forward(x, w_down, w_up, *,
                              compute_dtype=jnp.bfloat16, out_dtype=None):
    """Convenience wrapper taking raw PyTorch-layout weights.

    For repeated calls, prefer prepare_adapter_weights() once at parameter
    setup + adapter_forward_prepared() per step (hoists the weight cast /
    transpose out of the per-call path).
    """
    wd_t, wu_t = prepare_adapter_weights(w_down, w_up, compute_dtype)
    return adapter_forward_prepared(x, wd_t, wu_t, out_dtype=out_dtype)


def init_adapter_params(key, in_dim, hidden_dim, dtype=jnp.float32):
    """Deterministic init matching nn.Linear(bias=False) weight shapes."""
    k1, k2 = jax.random.split(key)
    bound_down = 1.0 / jnp.sqrt(in_dim)
    bound_up = 1.0 / jnp.sqrt(hidden_dim)
    w_down = jax.random.uniform(k1, (hidden_dim, in_dim), dtype,
                                minval=-bound_down, maxval=bound_down)
    w_up = jax.random.uniform(k2, (in_dim, hidden_dim), dtype,
                              minval=-bound_up, maxval=bound_up)
    return w_down, w_up


# TODO(synk): add_new_task / set_current_task are host-side parameter
# bookkeeping (ModuleList + requires_grad flags); they have no kernel
# equivalent — the kernel simply consumes the current task's weight pair.


if __name__ == "__main__":
    key = jax.random.PRNGKey(0)
    kx, kp = jax.random.split(key)

    batch, seq, in_dim, hidden_dim = 2, 8, 32, 16
    x = jax.random.normal(kx, (batch, seq, in_dim), dtype=jnp.float32)
    w_down, w_up = init_adapter_params(kp, in_dim, hidden_dim)

    # Pure-JAX reference (same semantics as the PyTorch forward).
    ref = jnp.maximum(x @ w_down.T, 0.0) @ w_up.T

    # f32 compute path: tight check.
    wd32, wu32 = prepare_adapter_weights(w_down, w_up, compute_dtype=jnp.float32)
    out_f32 = jax.block_until_ready(adapter_forward_prepared(x, wd32, wu32))
    assert out_f32.shape == x.shape
    assert out_f32.dtype == x.dtype
    assert jnp.allclose(out_f32, ref, atol=1e-5, rtol=1e-5)

    # Default bf16 compute path (performance config): looser tolerance.
    wdb, wub = prepare_adapter_weights(w_down, w_up)          # bf16 weights
    out_bf16c = jax.block_until_ready(adapter_forward_prepared(x, wdb, wub))
    assert out_bf16c.shape == x.shape
    assert out_bf16c.dtype == x.dtype
    assert jnp.allclose(out_bf16c.astype(jnp.float32), ref, atol=5e-2, rtol=5e-2)

    # bf16 output option (halves HBM writeback on this mem-bound kernel).
    out_bf16o = jax.block_until_ready(
        adapter_forward_prepared(x, wdb, wub, out_dtype=jnp.bfloat16))
    assert out_bf16o.shape == x.shape
    assert out_bf16o.dtype == jnp.bfloat16
    assert jnp.allclose(out_bf16o.astype(jnp.float32), ref, atol=7.5e-2, rtol=7.5e-2)

    # Convenience raw-weight wrapper.
    out_conv = jax.block_until_ready(
        continual_adapter_forward(x, w_down, w_up, compute_dtype=jnp.float32))
    assert jnp.allclose(out_conv, ref, atol=1e-5, rtol=1e-5)

    print("KERNEL_OK")
</pallas_src>

<mosaic_0001>
module attributes {stable_mosaic.version = 11 : i64} {
  func.func @_adapter_kernel(%arg0: i32, %arg1: memref<16x32xf32, #tpu.memory_space<vmem>>, %arg2: memref<32x16xf32, #tpu.memory_space<vmem>>, %arg3: memref<16x32xf32, #tpu.memory_space<vmem>>, %arg4: memref<16x32xf32, #tpu.memory_space<vmem>>) attributes {dimension_semantics = [#tpu.dimension_semantics<parallel>], iteration_bounds = array<i64: 1>, scalar_prefetch = 0 : i64, scratch_operands = 0 : i64, tpu.core_type = #tpu.core_type<tc>, window_params = [{transform_indices = @transform_0, window_bounds = array<i64: 16, 32>}, {pipeline_mode = #tpu.pipeline_mode<synchronous>, transform_indices = @transform_1, window_bounds = array<i64: 32, 16>}, {pipeline_mode = #tpu.pipeline_mode<synchronous>, transform_indices = @transform_2, window_bounds = array<i64: 16, 32>}, {transform_indices = @transform_3, window_bounds = array<i64: 16, 32>}]} {
    %c0 = arith.constant 0 : index
    %c0_0 = arith.constant 0 : index
    %0 = vector.load %arg1[%c0, %c0_0] : memref<16x32xf32, #tpu.memory_space<vmem>>, vector<16x32xf32>
    %c0_1 = arith.constant 0 : index
    %c0_2 = arith.constant 0 : index
    %1 = vector.load %arg2[%c0_1, %c0_2] : memref<32x16xf32, #tpu.memory_space<vmem>>, vector<32x16xf32>
    %cst = arith.constant dense<0.000000e+00> : vector<16x16xf32>
    %2 = tpu.matmul %0, %1, %cst {dimension_numbers = #tpu.dot_dimension_numbers<[1], [0], [0], [1], [0, 0, 1, 1], [], []>} : vector<16x32xf32>, vector<32x16xf32>, vector<16x16xf32> -> vector<16x16xf32>
    %cst_3 = arith.constant 0.000000e+00 : f32
    %3 = vector.broadcast %cst_3 : f32 to vector<16x16xf32>
    %4 = arith.maximumf %2, %3 : vector<16x16xf32>
    %c0_4 = arith.constant 0 : index
    %c0_5 = arith.constant 0 : index
    %5 = vector.load %arg3[%c0_4, %c0_5] : memref<16x32xf32, #tpu.memory_space<vmem>>, vector<16x32xf32>
    %cst_6 = arith.constant dense<0.000000e+00> : vector<16x32xf32>
    %6 = tpu.matmul %4, %5, %cst_6 {dimension_numbers = #tpu.dot_dimension_numbers<[1], [0], [0], [1], [0, 0, 1, 1], [], []>} : vector<16x16xf32>, vector<16x32xf32>, vector<16x32xf32> -> vector<16x32xf32>
    %c0_7 = arith.constant 0 : index
    %c0_8 = arith.constant 0 : index
    %7 = vector.load %arg4[%c0_7, %c0_8] : memref<16x32xf32, #tpu.memory_space<vmem>>, vector<16x32xf32>
    tpu.vector_store %arg4[%c0_7, %c0_8], %6 {strides = array<i32>} : memref<16x32xf32, #tpu.memory_space<vmem>>, vector<16x32xf32>,
    return
  }
  func.func @transform_0(%arg0: i32) -> (i32, i32) {
    %c0_i32 = arith.constant 0 : i32
    %c0_i32_0 = arith.constant 0 : i32
    return %arg0, %c0_i32 : i32, i32
  }
  func.func @transform_1(%arg0: i32) -> (i32, i32) {
    %c0_i32 = arith.constant 0 : i32
    %c0_i32_0 = arith.constant 0 : i32
    %c0_i32_1 = arith.constant 0 : i32
    return %c0_i32, %c0_i32_0 : i32, i32
  }
  func.func @transform_2(%arg0: i32) -> (i32, i32) {
    %c0_i32 = arith.constant 0 : i32
    %c0_i32_0 = arith.constant 0 : i32
    %c0_i32_1 = arith.constant 0 : i32
    return %c0_i32, %c0_i32_0 : i32, i32
  }
  func.func @transform_3(%arg0: i32) -> (i32, i32) {
    %c0_i32 = arith.constant 0 : i32
    %c0_i32_0 = arith.constant 0 : i32
    return %arg0, %c0_i32 : i32, i32
  }
}

</mosaic_0001>

<bundles_post_ra>
// kernel: adapter_forward_prepared.1
= control target key start
LH: loop header
LB: loop body
LE: loop exit
PB: predicated region body
PF: predicated region fallthrough
CT: control target
= control target key end

     0   :  { %vm21_vm0 = vcmask 261120   ;;  %s341_s0 = inlined_call_operand.vmem [shape: f32[16,32], index: 0, kind: input, shape index: {}]   ;;  %s342_s1 = inlined_call_operand.vmem [shape: f32[32,16], index: 1, kind: input, shape index: {}]   ;;  %s343_s2 = inlined_call_operand.vmem [shape: f32[16,32], index: 2, kind: input, shape index: {}]   ;;  %s344_s3 = inlined_call_operand.hbm [shape: f32[16,32], index: 3, kind: output, shape index: {}]  }
   0x1   :  { %v17_v0 = vld [vmem:[%s342_s1] sm:$0xff]  ;;  %v18_v1 = vld [vmem:[%s342_s1 + $0x8] sm:$0xff]  ;;  %v19_v2 = vld [vmem:[%s342_s1 + $0x10] sm:$0xff] }
   0x2   :  { %v239_v3 = vpack.c.bf16 %v18_v1, %v17_v0  ;;  %v20_v4 = vld [vmem:[%s342_s1 + $0x18] sm:$0xff]  ;;  %v15_v5 = vld [vmem:[%s341_s0] sm:$0xff] }
   0x3   :  { %v243_v6 = vpack.c.bf16 %v20_v4, %v19_v2  ;;  %229 = vmatprep.mubr.msk.f32.mxu0 %vm21_vm0, %v15_v5 }
   0x4   :  { %8 = vsyncpa [#allocation3], 0  ;;  %240 = vmatprep.subr.bf16.mxu0 %v239_v3  ;;  %v16_v7 = vld [vmem:[%s341_s0 + $0x8] sm:$0xff]  ;;  %v105_v8 = vld [vmem:[%s343_s2] sm:$0xff]  ;;  %vm107_vm1 = vcmask 130048   ;;  %s278_s0 = smov [#allocation2]  }
   0x5   :  { %242 = vmatpush3.bf16.msra.mxu0 %v239_v3  ;;  %v106_v9 = vld [vmem:[%s343_s2 + $0x8] sm:$0xff]  ;;  %s196_s27 = sshll.u32 %s278_s0, 4  ;;  %s197_s27 = int_to_ptr.vmem [resolvable:$true] %s196_s27 }
   0x6   :  { %244 = vmatprep.subr.bf16.mxu0 %v243_v6  ;;  %v247_v10 = vpack.c.bf16 %v106_v9, %v105_v8  ;;  %s254_s2 = scalar_lea.vmem %s197_s27, 256  ;;  %p259_p1 = scmp.lt.s32.totalorder %s197_s27, %s197_s27 }
   0x7   :  { %p255_p0 = scmp.ne.s32.totalorder %s197_s27, %s254_s2  ;;  %p260_p2 = scmp.lt.s32.totalorder %s254_s2, %s254_s2 }
   0x8   :  { %248 = vmatprep.subr.bf16.mxu1 %v247_v10 }
   0x9   :  { %246 = vmatpush3.bf16.msra.mxu0 %v243_v6  ;;  %250 = vmatpush3.bf16.msra.mxu1 %v247_v10  ;;  %p261_p3 = por %p260_p2, %p259_p1 }
   0xb   :  { %p262_p4 = pnand %p261_p3, %p255_p0 }
   0xc   :  { %230 = vmatmul.mubr.msk.f32.vlgmr.msra.gmra.mrb[0].mxu0 %vm21_vm0, %v16_v7 }
  0xdf   :  { %v231_v11 = vpop.f32.mrb[0].mxu0 }
  0xe0   :  { %v94_v12 = vpop.f32.mrb[1].mxu0  ;;  %v104_v14 = vmax.f32 %v231_v11, 0.0 }
  0xe1   :  { %v103_v13 = vmax.f32 %v94_v12, 0.0 }
  0xe3   :  { %236 = vmatprep.mubr.msk.f32.mxu1 %vm107_vm1, %v103_v13 }
  0xe4   :  { %237 = vmatmul.mubr.msk.f32.vlgmr.msra.gmra.mrb[0].mxu1 %vm107_vm1, %v104_v14 }
 0x1b7   :  { %v238_v15 = vpop.f32.mrb[0].mxu1 }
 0x1b8   :  { %190 = vst.msk [vmem:[#allocation2 + $0x8] sm:$0xff] %vm21_vm0, %v238_v15  ;;  %v180_v16 = vpop.f32.mrb[1].mxu1 }
 0x1b9   :  { %189 = vst.msk [vmem:[#allocation2] sm:$0xff] %vm21_vm0, %v180_v16 }
 0x1ba   :  { %265 = shalt.err (!%p262_p4)
}
 0x1bb   :  { %s266_s30 = scalar_lea.hbm %s344_s3, 256 }
 0x1bc   :  { %p267_p5 = scmp.ne.s32.totalorder %s344_s3, %s266_s30  ;;  %p270_p6 = scmp.lt.u32.totalorder %s266_s30, %s344_s3 }
 0x1be   :  { %p272_p7 = pnand %p270_p6, %p267_p5 }
 0x1c0   :  { %275 = shalt.err (!%p272_p7)
}
 0x1c1   :  { %s279_s8 = smov 128   ;;  %s280_s9 = smov 8  }
 0x1c2   :  { %202 = dma.vmem_to_hbm [thread:$0]  %s197_s27, 256, %s344_s3, [#allocation3], %s279_s8, %s279_s8, %s280_s9  }
 0x1c3   :  { %276 = dma.done.wait [#allocation3], 256  }
 0x1c4   :  { %277 = vsyncadd [#allocation3], 4294967040 }
 0x1c5   :  { %206 = vsyncpa [#allocation3], 1 }

</bundles_post_ra>
